<compile_context>
chip_gen: v7x
topology: tpu7x:2x2x1
jax: 0.10.0
libtpu: 0.0.40
codegen_flags: <defaults>
</compile_context>

<pallas_src>
import math
import functools

import jax
import jax.numpy as jnp
from jax import lax
from jax.experimental import pallas as pl
from jax.experimental.pallas import tpu as pltpu

EPS = 1e-5          # PyTorch BatchNorm1d default eps
NEG_SLOPE = 0.2     # leaky_relu negative slope


def _bn_lrelu(acc, gamma, beta, valid=None):
    """BatchNorm1d (training-mode batch stats, per-row over (N, F)) + LeakyReLU.

    acc:   (N, R, F) f32 conv output
    gamma: (R, 1) f32, beta: (R, 1) f32
    valid: optional (1, R, 1) bool; rows where False produce exactly 0
           (stands in for the zero padding of h consumed by the next conv).
    """
    n, _, f = acc.shape
    inv_cnt = 1.0 / (n * f)
    ssum = jnp.sum(acc, axis=(0, 2), keepdims=True)            # (1, R, 1)
    ssq = jnp.sum(acc * acc, axis=(0, 2), keepdims=True)       # (1, R, 1)
    mean = ssum * inv_cnt
    var = ssq * inv_cnt - mean * mean                          # single-pass var
    s = gamma[None, :, :] * lax.rsqrt(var + EPS)               # fold BN into FMA
    t = beta[None, :, :] - mean * s
    if valid is not None:
        s = jnp.where(valid, s, 0.0)
        t = jnp.where(valid, t, 0.0)
    y = acc * s + t
    return jnp.maximum(y, NEG_SLOPE * y)                       # leaky_relu(0.2)
    # TODO(synk): BatchNorm running_mean/running_var buffer updates (a
    # training-only side effect) are not materialized; forward is unaffected.


def _block_kernel(x_ref, w1_ref, g1_ref, b1_ref, w2_ref, g2_ref, b2_ref, o_ref,
                  *, kernel, pad, tile_t, t_total):
    n = x_ref.shape[0]
    text = tile_t + 2 * pad            # layer-1 rows incl. layer-2 halo
    win = text + kernel - 1            # padded-x rows feeding those
    t0 = pl.multiple_of(pl.program_id(0) * tile_t, tile_t)

    # ---- layer 1: Conv1d(D -> F) as a single fused MXU contraction ----
    xw = x_ref[:, pl.ds(t0, win), :]                                  # (N, win, D)
    cat1 = jnp.concatenate(
        [xw[:, j:j + text, :] for j in range(kernel)], axis=-1)       # (N, text, K*D)
    w1 = jnp.broadcast_to(w1_ref[...], (n,) + w1_ref.shape)           # (N, K*D, F)
    acc1 = jnp.einsum("nrk,nkf->nrf", cat1, w1,
                      preferred_element_type=jnp.float32)             # (N, text, F)

    # Halo rows outside [0, T) must be exactly zero for layer 2's conv padding.
    row = t0 - pad + lax.broadcasted_iota(jnp.int32, (1, text, 1), 1)
    valid = jnp.logical_and(row >= 0, row < t_total)
    h = _bn_lrelu(acc1,
                  g1_ref[pl.ds(t0, text), :],
                  b1_ref[pl.ds(t0, text), :], valid=valid)            # (N, text, F)

    # ---- layer 2: Conv1d(F -> F); halo already in registers ----
    cat2 = jnp.concatenate(
        [h[:, j:j + tile_t, :] for j in range(kernel)], axis=-1)      # (N, tT, K*F)
    w2 = jnp.broadcast_to(w2_ref[...], (n,) + w2_ref.shape)           # (N, K*F, F)
    acc2 = jnp.einsum("nrk,nkf->nrf", cat2, w2,
                      preferred_element_type=jnp.float32)             # (N, tT, F)
    out = _bn_lrelu(acc2, g2_ref[...], b2_ref[...])
    o_ref[...] = out.astype(o_ref.dtype)


def block_forward(x, w1_taps, g1, b1, w2_taps, g2, b2, *, kernel):
    """x: (N, T, D); w*_taps: (K, Cin, F); g*, b*: (T,). Returns (N, T, F) f32."""
    pad = math.ceil((kernel - 1) / 2)
    N, T, D = x.shape
    K = kernel
    F_ = w1_taps.shape[-1]

    # T is the only tileable axis (BN reduces over N and F). 8-row tiles at toy
    # sizes; raise toward the VMEM budget (64 MiB on v7x) for realistic T.
    tile_t = 8 if T % 8 == 0 else T
    grid = (T // tile_t,)
    tp = T + 2 * pad + (K - 1)                  # padded-T length (left 2*pad, right K-1)

    x_pad = jnp.pad(x.astype(jnp.float32), ((0, 0), (2 * pad, K - 1), (0, 0)))
    w1f = w1_taps.astype(jnp.float32).reshape(K * D, F_)       # (K*D, F): fused taps
    w2f = w2_taps.astype(jnp.float32).reshape(K * F_, F_)      # (K*F, F)
    g1p = jnp.pad(g1.astype(jnp.float32).reshape(T, 1), ((pad, pad), (0, 0)))
    b1p = jnp.pad(b1.astype(jnp.float32).reshape(T, 1), ((pad, pad), (0, 0)))
    g2r = g2.astype(jnp.float32).reshape(T, 1)
    b2r = b2.astype(jnp.float32).reshape(T, 1)

    def const(shape):
        return pl.BlockSpec(shape, lambda i, _s=shape: (0,) * len(_s))

    return pl.pallas_call(
        functools.partial(_block_kernel, kernel=K, pad=pad,
                          tile_t=tile_t, t_total=T),
        out_shape=jax.ShapeDtypeStruct((N, T, F_), jnp.float32),
        grid=grid,
        in_specs=[
            const((N, tp, D)),                              # x_pad (resident, halo-sliced)
            const((K * D, F_)),                             # fused conv1 weight
            const((T + 2 * pad, 1)),                        # gamma1 (padded for halo rows)
            const((T + 2 * pad, 1)),                        # beta1
            const((K * F_, F_)),                            # fused conv2 weight
            pl.BlockSpec((tile_t, 1), lambda i: (i, 0)),    # gamma2 per T-tile
            pl.BlockSpec((tile_t, 1), lambda i: (i, 0)),    # beta2 per T-tile
        ],
        out_specs=pl.BlockSpec((N, tile_t, F_), lambda i: (0, i, 0)),
        compiler_params=pltpu.CompilerParams(
            dimension_semantics=("parallel",)),             # 2 TCs on v7x
    )(x_pad, w1f, g1p, b1p, w2f, g2r, b2r)


def _reference(x, w1_torch, g1, b1, w2_torch, g2, b2, kernel):
    """Pure-JAX mirror of the PyTorch forward (conv weights in torch layout)."""
    pad = math.ceil((kernel - 1) / 2)

    def c1d(x, w, g, b):
        xc = jnp.transpose(x, (0, 2, 1))                   # (N, Cin, T)
        y = lax.conv_general_dilated(
            xc, w, window_strides=(1,), padding=[(pad, pad)],
            dimension_numbers=("NCH", "OIH", "NCH"))
        if kernel % 2 == 0:
            y = y[:, :, :-1]
        y = jnp.transpose(y, (0, 2, 1))                    # (N, T, F)
        mean = jnp.mean(y, axis=(0, 2), keepdims=True)
        var = jnp.var(y, axis=(0, 2), keepdims=True)
        yn = (y - mean) / jnp.sqrt(var + EPS)
        yn = yn * g[None, :, None] + b[None, :, None]
        return jnp.where(yn > 0, yn, NEG_SLOPE * yn)

    h = c1d(x, w1_torch, g1, b1)
    return c1d(h, w2_torch, g2, b2)


if __name__ == "__main__":
    # block(input_channels=16, input_dims=8, filters=16, kernel=3)
    N, T, D, F_, K = 2, 16, 8, 16, 3

    key = jax.random.PRNGKey(0)
    kx, kw1, kw2, kg1, kb1, kg2, kb2 = jax.random.split(key, 7)

    x = jax.random.normal(kx, (N, T, D), jnp.float32)
    # Conv weights in torch layout (F, Cin, K); non-trivial BN affine params.
    w1_torch = 0.2 * jax.random.normal(kw1, (F_, D, K), jnp.float32)
    w2_torch = 0.2 * jax.random.normal(kw2, (F_, F_, K), jnp.float32)
    g1 = 1.0 + 0.1 * jax.random.normal(kg1, (T,), jnp.float32)
    b1 = 0.1 * jax.random.normal(kb1, (T,), jnp.float32)
    g2 = 1.0 + 0.1 * jax.random.normal(kg2, (T,), jnp.float32)
    b2 = 0.1 * jax.random.normal(kb2, (T,), jnp.float32)

    # Kernel-friendly tap layout: (K, Cin, F)
    w1_taps = jnp.transpose(w1_torch, (2, 1, 0))
    w2_taps = jnp.transpose(w2_torch, (2, 1, 0))

    out = block_forward(x, w1_taps, g1, b1, w2_taps, g2, b2, kernel=K)
    out = jax.block_until_ready(out)

    ref = _reference(x, w1_torch, g1, b1, w2_torch, g2, b2, K)
    assert out.shape == (N, T, F_), out.shape
    max_err = float(jnp.max(jnp.abs(out - ref)))
    assert jnp.allclose(out, ref, atol=5e-4, rtol=5e-4), max_err

    print("KERNEL_OK")
</pallas_src>

<mosaic_0001>
module attributes {stable_mosaic.version = 11 : i64} {
  func.func @_block_kernel(%arg0: i32, %arg1: memref<2x20x8xf32, #tpu.memory_space<vmem>>, %arg2: memref<24x16xf32, #tpu.memory_space<vmem>>, %arg3: memref<18x1xf32, #tpu.memory_space<vmem>>, %arg4: memref<18x1xf32, #tpu.memory_space<vmem>>, %arg5: memref<48x16xf32, #tpu.memory_space<vmem>>, %arg6: memref<8x1xf32, #tpu.memory_space<vmem>>, %arg7: memref<8x1xf32, #tpu.memory_space<vmem>>, %arg8: memref<2x8x16xf32, #tpu.memory_space<vmem>>) attributes {dimension_semantics = [#tpu.dimension_semantics<parallel>], iteration_bounds = array<i64: 2>, scalar_prefetch = 0 : i64, scratch_operands = 0 : i64, tpu.core_type = #tpu.core_type<tc>, window_params = [{pipeline_mode = #tpu.pipeline_mode<synchronous>, transform_indices = @transform_0, window_bounds = array<i64: 2, 20, 8>}, {pipeline_mode = #tpu.pipeline_mode<synchronous>, transform_indices = @transform_1, window_bounds = array<i64: 24, 16>}, {pipeline_mode = #tpu.pipeline_mode<synchronous>, transform_indices = @transform_2, window_bounds = array<i64: 18, 1>}, {pipeline_mode = #tpu.pipeline_mode<synchronous>, transform_indices = @transform_3, window_bounds = array<i64: 18, 1>}, {pipeline_mode = #tpu.pipeline_mode<synchronous>, transform_indices = @transform_4, window_bounds = array<i64: 48, 16>}, {transform_indices = @transform_5, window_bounds = array<i64: 8, 1>}, {transform_indices = @transform_6, window_bounds = array<i64: 8, 1>}, {transform_indices = @transform_7, window_bounds = array<i64: 2, 8, 16>}]} {
    %c8_i32 = arith.constant 8 : i32
    %0 = arith.muli %arg0, %c8_i32 : i32
    %1 = tpu.assume_multiple %0, 8 : i32
    %c0 = arith.constant 0 : index
    %2 = arith.index_cast %1 : i32 to index
    %c0_0 = arith.constant 0 : index
    %3 = vector.load %arg1[%c0, %2, %c0_0] : memref<2x20x8xf32, #tpu.memory_space<vmem>>, vector<2x12x8xf32>
    %4 = vector.extract_strided_slice %3 {offsets = [0, 0, 0], sizes = [2, 10, 8], strides = [1, 1, 1]} : vector<2x12x8xf32> to vector<2x10x8xf32>
    %5 = vector.extract_strided_slice %3 {offsets = [0, 1, 0], sizes = [2, 10, 8], strides = [1, 1, 1]} : vector<2x12x8xf32> to vector<2x10x8xf32>
    %6 = vector.extract_strided_slice %3 {offsets = [0, 2, 0], sizes = [2, 10, 8], strides = [1, 1, 1]} : vector<2x12x8xf32> to vector<2x10x8xf32>
    %7 = tpu.concatenate %4, %5, %6 in 2 : vector<2x10x8xf32>, vector<2x10x8xf32>, vector<2x10x8xf32> -> vector<2x10x24xf32>
    %c0_1 = arith.constant 0 : index
    %c0_2 = arith.constant 0 : index
    %8 = vector.load %arg2[%c0_1, %c0_2] : memref<24x16xf32, #tpu.memory_space<vmem>>, vector<24x16xf32>
    %9 = vector.shape_cast %8 : vector<24x16xf32> to vector<1x24x16xf32>
    %10 = vector.broadcast %9 : vector<1x24x16xf32> to vector<2x24x16xf32>
    "tpu.trace_start"() <{level = 10 : i32, message = "nrk,nkf->nrf"}> : () -> ()
    %cst = arith.constant dense<0.000000e+00> : vector<2x10x16xf32>
    %11 = tpu.matmul %7, %10, %cst {dimension_numbers = #tpu.dot_dimension_numbers<[2], [1], [1], [2], [0, 0, 0, 1, 1, 2], [0], [0]>} : vector<2x10x24xf32>, vector<2x24x16xf32>, vector<2x10x16xf32> -> vector<2x10x16xf32>
    "tpu.trace_stop"() : () -> ()
    %c1_i32 = arith.constant 1 : i32
    %12 = arith.subi %1, %c1_i32 : i32
    %13 = tpu.iota {dimensions = array<i32: 1>} : vector<1x10x1xi32>
    %14 = vector.broadcast %12 : i32 to vector<1x10x1xi32>
    %15 = arith.addi %14, %13 : vector<1x10x1xi32>
    %c0_i32 = arith.constant 0 : i32
    %16 = vector.broadcast %c0_i32 : i32 to vector<1x10x1xi32>
    %17 = arith.cmpi sge, %15, %16 : vector<1x10x1xi32>
    %c16_i32 = arith.constant 16 : i32
    %18 = vector.broadcast %c16_i32 : i32 to vector<1x10x1xi32>
    %19 = arith.cmpi slt, %15, %18 : vector<1x10x1xi32>
    %20 = arith.andi %17, %19 : vector<1x10x1xi1>
    %21 = arith.index_cast %1 : i32 to index
    %c0_3 = arith.constant 0 : index
    %22 = vector.load %arg3[%21, %c0_3] : memref<18x1xf32, #tpu.memory_space<vmem>>, vector<10x1xf32>
    %23 = arith.index_cast %1 : i32 to index
    %c0_4 = arith.constant 0 : index
    %24 = vector.load %arg4[%23, %c0_4] : memref<18x1xf32, #tpu.memory_space<vmem>>, vector<10x1xf32>
    %cst_5 = arith.constant dense<0.000000e+00> : vector<10xf32>
    %25 = vector.multi_reduction <add>, %11, %cst_5 [0, 2] : vector<2x10x16xf32> to vector<10xf32>
    %26 = vector.shape_cast %25 : vector<10xf32> to vector<1x10x1xf32>
    %27 = arith.mulf %11, %11 : vector<2x10x16xf32>
    %cst_6 = arith.constant dense<0.000000e+00> : vector<10xf32>
    %28 = vector.multi_reduction <add>, %27, %cst_6 [0, 2] : vector<2x10x16xf32> to vector<10xf32>
    %29 = vector.shape_cast %28 : vector<10xf32> to vector<1x10x1xf32>
    %cst_7 = arith.constant 3.125000e-02 : f32
    %30 = vector.broadcast %cst_7 : f32 to vector<1x10x1xf32>
    %31 = arith.mulf %26, %30 : vector<1x10x1xf32>
    %cst_8 = arith.constant 3.125000e-02 : f32
    %32 = vector.broadcast %cst_8 : f32 to vector<1x10x1xf32>
    %33 = arith.mulf %29, %32 : vector<1x10x1xf32>
    %34 = arith.mulf %31, %31 : vector<1x10x1xf32>
    %35 = arith.subf %33, %34 : vector<1x10x1xf32>
    %36 = vector.shape_cast %22 : vector<10x1xf32> to vector<1x10x1xf32>
    %cst_9 = arith.constant 9.99999974E-6 : f32
    %37 = vector.broadcast %cst_9 : f32 to vector<1x10x1xf32>
    %38 = arith.addf %35, %37 : vector<1x10x1xf32>
    %39 = math.rsqrt %38 : vector<1x10x1xf32>
    %40 = arith.mulf %36, %39 : vector<1x10x1xf32>
    %41 = vector.shape_cast %24 : vector<10x1xf32> to vector<1x10x1xf32>
    %42 = arith.mulf %31, %40 : vector<1x10x1xf32>
    %43 = arith.subf %41, %42 : vector<1x10x1xf32>
    %cst_10 = arith.constant 0.000000e+00 : f32
    %44 = vector.broadcast %cst_10 : f32 to vector<1x10x1xf32>
    %45 = arith.select %20, %40, %44 : vector<1x10x1xi1>, vector<1x10x1xf32>
    %cst_11 = arith.constant 0.000000e+00 : f32
    %46 = vector.broadcast %cst_11 : f32 to vector<1x10x1xf32>
    %47 = arith.select %20, %43, %46 : vector<1x10x1xi1>, vector<1x10x1xf32>
    %48 = vector.broadcast %45 : vector<1x10x1xf32> to vector<2x10x16xf32>
    %49 = arith.mulf %11, %48 : vector<2x10x16xf32>
    %50 = vector.broadcast %47 : vector<1x10x1xf32> to vector<2x10x16xf32>
    %51 = arith.addf %49, %50 : vector<2x10x16xf32>
    %cst_12 = arith.constant 2.000000e-01 : f32
    %52 = vector.broadcast %cst_12 : f32 to vector<2x10x16xf32>
    %53 = arith.mulf %52, %51 : vector<2x10x16xf32>
    %54 = arith.maximumf %51, %53 : vector<2x10x16xf32>
    %55 = vector.extract_strided_slice %54 {offsets = [0, 0, 0], sizes = [2, 8, 16], strides = [1, 1, 1]} : vector<2x10x16xf32> to vector<2x8x16xf32>
    %56 = vector.extract_strided_slice %54 {offsets = [0, 1, 0], sizes = [2, 8, 16], strides = [1, 1, 1]} : vector<2x10x16xf32> to vector<2x8x16xf32>
    %57 = vector.extract_strided_slice %54 {offsets = [0, 2, 0], sizes = [2, 8, 16], strides = [1, 1, 1]} : vector<2x10x16xf32> to vector<2x8x16xf32>
    %58 = tpu.concatenate %55, %56, %57 in 2 : vector<2x8x16xf32>, vector<2x8x16xf32>, vector<2x8x16xf32> -> vector<2x8x48xf32>
    %c0_13 = arith.constant 0 : index
    %c0_14 = arith.constant 0 : index
    %59 = vector.load %arg5[%c0_13, %c0_14] : memref<48x16xf32, #tpu.memory_space<vmem>>, vector<48x16xf32>
    %60 = vector.shape_cast %59 : vector<48x16xf32> to vector<1x48x16xf32>
    %61 = vector.broadcast %60 : vector<1x48x16xf32> to vector<2x48x16xf32>
    "tpu.trace_start"() <{level = 10 : i32, message = "nrk,nkf->nrf"}> : () -> ()
    %cst_15 = arith.constant dense<0.000000e+00> : vector<2x8x16xf32>
    %62 = tpu.matmul %58, %61, %cst_15 {dimension_numbers = #tpu.dot_dimension_numbers<[2], [1], [1], [2], [0, 0, 0, 1, 1, 2], [0], [0]>} : vector<2x8x48xf32>, vector<2x48x16xf32>, vector<2x8x16xf32> -> vector<2x8x16xf32>
    "tpu.trace_stop"() : () -> ()
    %c0_16 = arith.constant 0 : index
    %c0_17 = arith.constant 0 : index
    %63 = vector.load %arg6[%c0_16, %c0_17] : memref<8x1xf32, #tpu.memory_space<vmem>>, vector<8x1xf32>
    %c0_18 = arith.constant 0 : index
    %c0_19 = arith.constant 0 : index
    %64 = vector.load %arg7[%c0_18, %c0_19] : memref<8x1xf32, #tpu.memory_space<vmem>>, vector<8x1xf32>
    %cst_20 = arith.constant dense<0.000000e+00> : vector<8xf32>
    %65 = vector.multi_reduction <add>, %62, %cst_20 [0, 2] : vector<2x8x16xf32> to vector<8xf32>
    %66 = vector.shape_cast %65 : vector<8xf32> to vector<1x8x1xf32>
    %67 = arith.mulf %62, %62 : vector<2x8x16xf32>
    %cst_21 = arith.constant dense<0.000000e+00> : vector<8xf32>
    %68 = vector.multi_reduction <add>, %67, %cst_21 [0, 2] : vector<2x8x16xf32> to vector<8xf32>
    %69 = vector.shape_cast %68 : vector<8xf32> to vector<1x8x1xf32>
    %cst_22 = arith.constant 3.125000e-02 : f32
    %70 = vector.broadcast %cst_22 : f32 to vector<1x8x1xf32>
    %71 = arith.mulf %66, %70 : vector<1x8x1xf32>
    %cst_23 = arith.constant 3.125000e-02 : f32
    %72 = vector.broadcast %cst_23 : f32 to vector<1x8x1xf32>
    %73 = arith.mulf %69, %72 : vector<1x8x1xf32>
    %74 = arith.mulf %71, %71 : vector<1x8x1xf32>
    %75 = arith.subf %73, %74 : vector<1x8x1xf32>
    %76 = vector.shape_cast %63 : vector<8x1xf32> to vector<1x8x1xf32>
    %cst_24 = arith.constant 9.99999974E-6 : f32
    %77 = vector.broadcast %cst_24 : f32 to vector<1x8x1xf32>
    %78 = arith.addf %75, %77 : vector<1x8x1xf32>
    %79 = math.rsqrt %78 : vector<1x8x1xf32>
    %80 = arith.mulf %76, %79 : vector<1x8x1xf32>
    %81 = vector.shape_cast %64 : vector<8x1xf32> to vector<1x8x1xf32>
    %82 = arith.mulf %71, %80 : vector<1x8x1xf32>
    %83 = arith.subf %81, %82 : vector<1x8x1xf32>
    %84 = vector.broadcast %80 : vector<1x8x1xf32> to vector<2x8x16xf32>
    %85 = arith.mulf %62, %84 : vector<2x8x16xf32>
    %86 = vector.broadcast %83 : vector<1x8x1xf32> to vector<2x8x16xf32>
    %87 = arith.addf %85, %86 : vector<2x8x16xf32>
    %cst_25 = arith.constant 2.000000e-01 : f32
    %88 = vector.broadcast %cst_25 : f32 to vector<2x8x16xf32>
    %89 = arith.mulf %88, %87 : vector<2x8x16xf32>
    %90 = arith.maximumf %87, %89 : vector<2x8x16xf32>
    %c0_26 = arith.constant 0 : index
    %c0_27 = arith.constant 0 : index
    %c0_28 = arith.constant 0 : index
    %91 = vector.load %arg8[%c0_26, %c0_27, %c0_28] : memref<2x8x16xf32, #tpu.memory_space<vmem>>, vector<2x8x16xf32>
    tpu.vector_store %arg8[%c0_26, %c0_27, %c0_28], %90 {strides = array<i32>} : memref<2x8x16xf32, #tpu.memory_space<vmem>>, vector<2x8x16xf32>,
    return
  }
  func.func @transform_0(%arg0: i32) -> (i32, i32, i32) {
    %c0_i32 = arith.constant 0 : i32
    %c0_i32_0 = arith.constant 0 : i32
    %c0_i32_1 = arith.constant 0 : i32
    %c0_i32_2 = arith.constant 0 : i32
    return %c0_i32, %c0_i32_0, %c0_i32_1 : i32, i32, i32
  }
  func.func @transform_1(%arg0: i32) -> (i32, i32) {
    %c0_i32 = arith.constant 0 : i32
    %c0_i32_0 = arith.constant 0 : i32
    %c0_i32_1 = arith.constant 0 : i32
    return %c0_i32, %c0_i32_0 : i32, i32
  }
  func.func @transform_2(%arg0: i32) -> (i32, i32) {
    %c0_i32 = arith.constant 0 : i32
    %c0_i32_0 = arith.constant 0 : i32
    %c0_i32_1 = arith.constant 0 : i32
    return %c0_i32, %c0_i32_0 : i32, i32
  }
  func.func @transform_3(%arg0: i32) -> (i32, i32) {
    %c0_i32 = arith.constant 0 : i32
    %c0_i32_0 = arith.constant 0 : i32
    %c0_i32_1 = arith.constant 0 : i32
    return %c0_i32, %c0_i32_0 : i32, i32
  }
  func.func @transform_4(%arg0: i32) -> (i32, i32) {
    %c0_i32 = arith.constant 0 : i32
    %c0_i32_0 = arith.constant 0 : i32
    %c0_i32_1 = arith.constant 0 : i32
    return %c0_i32, %c0_i32_0 : i32, i32
  }
  func.func @transform_5(%arg0: i32) -> (i32, i32) {
    %c0_i32 = arith.constant 0 : i32
    %c0_i32_0 = arith.constant 0 : i32
    return %arg0, %c0_i32 : i32, i32
  }
  func.func @transform_6(%arg0: i32) -> (i32, i32) {
    %c0_i32 = arith.constant 0 : i32
    %c0_i32_0 = arith.constant 0 : i32
    return %arg0, %c0_i32 : i32, i32
  }
  func.func @transform_7(%arg0: i32) -> (i32, i32, i32) {
    %c0_i32 = arith.constant 0 : i32
    %c0_i32_0 = arith.constant 0 : i32
    %c0_i32_1 = arith.constant 0 : i32
    return %c0_i32, %arg0, %c0_i32_0 : i32, i32, i32
  }
}

</mosaic_0001>

<bundles_post_ra>
// kernel: tpu_custom_call.1
= control target key start
LH: loop header
LB: loop body
LE: loop exit
PB: predicated region body
PF: predicated region fallthrough
CT: control target
= control target key end

     0   :  { %12 = vsyncpa [#allocation3], 0  ;;  %s1442_s0 = inlined_call_operand.vmem [shape: f32[2,20,8], index: 0, kind: input, shape index: {}]   ;;  %s1443_s1 = inlined_call_operand.vmem [shape: f32[24,16], index: 1, kind: input, shape index: {}]   ;;  %s1444_s2 = inlined_call_operand.vmem [shape: f32[18,1], index: 2, kind: input, shape index: {}]   ;;  %s1445_s3 = inlined_call_operand.vmem [shape: f32[18,1], index: 3, kind: input, shape index: {}]   ;;  %s1446_s4 = inlined_call_operand.vmem [shape: f32[48,16], index: 4, kind: input, shape index: {}]   ;;  %s1447_s5 = inlined_call_operand.vmem [shape: f32[16,1], index: 5, kind: input, shape index: {}]   ;;  %s1448_s6 = inlined_call_operand.vmem [shape: f32[16,1], index: 6, kind: input, shape index: {}]   ;;  %s1449_s7 = inlined_call_operand.hbm [shape: f32[2,16,16], index: 7, kind: output, shape index: {}]  }
   0x1   :  { %14 = vsyncpa [#allocation3 + $0x1], 0  ;;  %s1226_s24 = smov 0   ;;  %s1228_s25 = smov 0  }
   0x2   :  { %s1230_s26 = smov 0   ;;  %s1232_s27 = smov 0  }
   0x3 LB: > { %s1247_s28 = sadd.s32 4294967295, %s1174_s27   ;;  %s939_s29 = sadd.s32 4294967294, %s1174_s27   ;;  %s1174_s27 = sphi %s1232_s27, %s1455_s27   ;;  %s1170_s26 = sphi %s1230_s26, %s1454_s26   ;;  %s1166_s25 = sphi %s1228_s25, %s1453_s25   ;;  %s1162_s24 = sphi %s1226_s24, %s1452_s24  }
   0x4   : > { %s1251_s30 = sadd.s32 1, %s1174_s27   ;;  %s184_s8 = sadd.s32 1, %s1170_s26 }
   0x5   : > { %s181_s9 = ssub.s32 %s1174_s27, %s1251_s30  ;;  %p194_p0 = scmp.ne.s32.totalorder %s1170_s26, %s1166_s25 }
   0x6   : > { %p182_p1 = scmp.eq.s32.totalorder %s181_s9, 0  ;;  %p195_p2 = scmp.eq.s32.totalorder %s1247_s28, 1 }
   0x7   : > { %p200_p3 = scmp.ne.s32.totalorder %s1166_s25, %s1162_s24  ;;  %p201_p4 = scmp.eq.s32.totalorder %s939_s29, 1 }
   0x8   : > { %s1262_s10 = scalar_select %p182_p1, %s1170_s26, %s184_s8  }
   0x9   : > { %p1264_p5 = por %p195_p2, %p194_p0  ;;  %p1268_p6 = por %p201_p4, %p200_p3 }
   0xa   : > { %p942_p7 = scmp.ge.s32.totalorder %s1174_s27, 1  ;;  %p248_p8 = scmp.lt.s32.totalorder %s1174_s27, 3 }
   0xc   : > { %p249_p9 = pnand %p942_p7, %p248_p8 }
   0xd   : > { %s1275_s13 = sshll.u32 (!%p249_p9), %s1247_s28, 3  ;;  %v349_v0 = vld [vmem:[%s1443_s1] sm:$0xff] (!%p249_p9)  ;;  %v350_v1 = vld [vmem:[%s1443_s1 + $0x8] sm:$0xff] (!%p249_p9)  ;;  %vm301_vm0 = vcmask (!%p249_p9), 1046528   ;;  %v351_v11 = vld [vmem:[%s1443_s1 + $0x10] sm:$0xff] (!%p249_p9)  ;;  %s1176_s23 = smov (!%p249_p9), 8  }
   0xe   : > { %252 = sbr.rel (%p249_p9) target bundleno = 1333 (0x535), region = 48  ;;  %s292_s18 = scalar_lea.vmem (!%p249_p9), %s1442_s0, %s1275_s13  ;;  %v1030_v5 = vpack.c.bf16 (!%p249_p9), %v350_v1, %v349_v0  ;;  %vm320_vm1 = vcmask (!%p249_p9), 1045504   ;;  %vm339_vm2 = vcmask (!%p249_p9), 64512   ;;  %vm344_vm3 = vcmask (!%p249_p9), 130048  }
   0xf   : > { %v294_v2 = vld [vmem:[%s292_s18 + $0x8] sm:$0xf] (!%p249_p9)  ;;  %v293_v3 = vld [vmem:[%s292_s18] sm:$0xff] (!%p249_p9)  ;;  %v295_v9 = vld [vmem:[%s292_s18 + $0x18] sm:$0xff] (!%p249_p9)  ;;  %s1177_s29 = smov (!%p249_p9), 16   ;;  %vm352_vm4 = vcmask (!%p249_p9), 195584   ;;  %v516_v0 = vlaneseq (!%p249_p9)  ;;  %s528_s15 = scalar_lea.vmem (!%p249_p9), %s1444_s2, %s1275_s13 }
  0x10   : > { %v296_v4 = vld [vmem:[%s292_s18 + $0x20] sm:$0xf] (!%p249_p9)  ;;  %v303_v6 = vrot.slane (!%p249_p9), %v294_v2, 1  ;;  %v302_v7 = vrot.slane (!%p249_p9), %v293_v3, 1  ;;  %v305_v10 = vrot.slane (!%p249_p9), %v295_v9, 1  ;;  %1035 = vmatprep.subr.bf16.mxu1 (!%p249_p9), %v1030_v5  ;;  %1031 = vmatprep.subr.bf16.mxu0 (!%p249_p9), %v1030_v5  ;;  %v324_v13 = vrot.slane (!%p249_p9), %v295_v9, 2  ;;  %s531_s18 = scalar_lea.vmem (!%p249_p9), %s1445_s3, %s1275_s13 }
  0x11   : > { %v306_v8 = vrot.slane (!%p249_p9), %v296_v4, 1  ;;  %1037 = vmatpush3.bf16.msra.mxu1 (!%p249_p9), %v1030_v5  ;;  %v325_v14 = vrot.slane (!%p249_p9), %v296_v4, 2  ;;  %1033 = vmatpush3.bf16.msra.mxu0 (!%p249_p9), %v1030_v5  ;;  %v322_v15 = vrot.slane (!%p249_p9), %v294_v2, 2  ;;  %v321_v17 = vrot.slane (!%p249_p9), %v293_v3, 2  ;;  %s951_s8 = sadd.s32 (!%p249_p9), 4294967295, %s1275_s13  ;;  %s1182_s13 = smov (!%p249_p9), 32  }
  0x12   : > { %310 = vrot.lane.b32.xlu1 (!%p249_p9), %v303_v6, %s1176_s23  ;;  %v304_v12 = vsel (!%p249_p9), %vm301_vm0, %v302_v7, %v303_v6  ;;  %995 = vmatprep.subr.mxu1 (!%p249_p9), %v351_v11  ;;  %vm539_vm5 = vcmask (!%p249_p9), 123904   ;;  %v1178_v56 = vmov (!%p249_p9), 0   ;;  %v517_v6 = vshrl.u32 (!%p249_p9), %v516_v0, 7  ;;  %p283_p10 = scmp.lt.s32.totalorder (!%p249_p9), %s1247_s28, 1 }
  0x13   : > { %308 = vrot.lane.b32.xlu0 (!%p249_p9), %v304_v12, %s1176_s23  ;;  %v307_v16 = vsel (!%p249_p9), %vm301_vm0, %v305_v10, %v306_v8  ;;  %986 = vmatprep.subr.mxu0 (!%p249_p9), %v351_v11  ;;  %v326_v18 = vsel (!%p249_p9), %vm320_vm1, %v324_v13, %v325_v14  ;;  %v323_v19 = vsel (!%p249_p9), %vm320_vm1, %v321_v17, %v322_v15  ;;  %v529_v13 = vld [vmem:[%s528_s15] sm:$0xff] (!%p249_p9)  ;;  %v530_v17 = vld [vmem:[%s528_s15 + $0x8] sm:$0x3] (!%p249_p9)  ;;  %vm1180_vm12 = vmmov (!%p249_p9), 0   ;;  %s280_s15 = sand.u32 (!%p249_p9), 1, %s1166_s25  }
  0x14   : > { %1105 = vset.pattern.permute.xlu1 (!%p249_p9), %v1178_v56  ;;  %1104 = vset.pattern.permute.xlu0 (!%p249_p9), %v1178_v56  ;;  %vm647_vm13 = vcmask (!%p249_p9), 261120   ;;  %vm656_vm14 = vcmask (!%p249_p9), 392192   ;;  %s943_s16 = sshll.u32 (!%p249_p9), %s280_s15, 4  ;;  %s1400_s21 = scalar_lea.sflag (!%p249_p9), [#allocation3], %s280_s15 }
  0x15   : > { %996 = vmatpush3.msra.mxu1 %v351_v11  ;;  %987 = vmatpush3.msra.mxu0 %v351_v11  ;;  %v518_v11 = vadd.s32 8, %v517_v6  ;;  %s282_s17 = scalar_lea.vmem [#allocation2], %s943_s16 }
  0x16   : > { %314 = vrot.lane.b32.xlu1 %v306_v8, %s1176_s23  ;;  %v519_v8 = vstv %s951_s8 }
  0x17   : > { %312 = vrot.lane.b32.xlu0 %v307_v16, %s1176_s23  ;;  %v520_v10 = vadd.s32 %v519_v8, %v517_v6  ;;  %v521_v12 = vadd.s32 %v519_v8, %v518_v11  ;;  %v532_v16 = vld [vmem:[%s531_s18] sm:$0xff] }
  0x19   : > { %vm522_vm6 = vcmp.ge.s32.totalorder %v520_v10, 0  ;;  %vm524_vm7 = vcmp.lt.s32.totalorder %v520_v10, 16  ;;  %vm523_vm9 = vcmp.ge.s32.totalorder %v521_v12, 0  ;;  %vm525_vm10 = vcmp.lt.s32.totalorder %v521_v12, 16 }
  0x1a   : > { %331 = vrot.lane.b32.xlu1 %v326_v18, %s1177_s29  ;;  %vm526_vm8 = vmand %vm522_vm6, %vm524_vm7 }
  0x1b   : > { %327 = vrot.lane.b32.xlu0 %v323_v19, %s1177_s29  ;;  %vm527_vm11 = vmand %vm523_vm9, %vm525_vm10 }
  0x1e   : > { %333 = vrot.lane.b32.xlu1 %v325_v14, %s1177_s29 }
  0x1f   : > { %329 = vrot.lane.b32.xlu0 %v322_v15, %s1177_s29 }
  0x84   : > { %v311_v20 = vpop.permute.xlu1 %310 }
  0x85   : > { %v309_v21 = vpop.permute.xlu0 %308  ;;  %v341_v32 = vsel %vm339_vm2, %v294_v2, %v311_v20 }
  0x86   : > { %v340_v26 = vsel %vm339_vm2, %v293_v3, %v309_v21 }
  0x88   : > { %v315_v22 = vpop.permute.xlu1 %314 }
  0x89   : > { %v313_v23 = vpop.permute.xlu0 %312  ;;  %v343_v30 = vsel %vm339_vm2, %v296_v4, %v315_v22 }
  0x8a   : > { %v342_v24 = vsel %vm339_vm2, %v295_v9, %v313_v23  ;;  %v533_v23 = vld [vmem:[%s531_s18 + $0x8] sm:$0x3]  ;;  %s859_s18 = sshll.u32 %s282_s17, 4  ;;  %s1391_s18 = int_to_ptr.vmem [resolvable:$true] %s859_s18 }
  0x8c   : > { %v332_v25 = vpop.permute.xlu1 %331 }
  0x8d   : > { %v328_v27 = vpop.permute.xlu0 %327  ;;  %v347_v28 = vsel %vm344_vm3, %v342_v24, %v332_v25 }
  0x8e   : > { %997 = vmatprep.mubr.msk.f32.mxu1 %vm352_vm4, %v347_v28  ;;  %v345_v29 = vsel %vm344_vm3, %v340_v26, %v328_v27 }
  0x8f   : > { %988 = vmatprep.mubr.msk.f32.mxu0 %vm352_vm4, %v345_v29  ;;  %v650_v29 = vld [vmem:[%s1446_s4] sm:$0xff] }
  0x90   : > { %v334_v31 = vpop.permute.xlu1 %333 }
  0x91   : > { %v348_v33 = vsel %vm344_vm3, %v343_v30, %v334_v31  ;;  %v330_v34 = vpop.permute.xlu0 %329  ;;  %v651_v30 = vld [vmem:[%s1446_s4 + $0x8] sm:$0xff]  ;;  %v1179_v31 = vmov 0.0|0.0  }
  0x92   : > { %v346_v35 = vsel %vm344_vm3, %v341_v32, %v330_v34  ;;  %998 = vmatmul.mubr.msk.f32.vlgmr.msra.gmra.mrb[0].mxu1 %vm352_vm4, %v348_v33  ;;  %1038 = vmatprep.subr.bf16.mxu0 %v1179_v31  ;;  %v1039_v32 = vpack.c.bf16 %v651_v30, %v650_v29 }
  0x93   : > { %989 = vmatmul.mubr.msk.f32.vlgmr.msra.gmra.mrb[0].mxu0 %vm352_vm4, %v346_v35  ;;  %1047 = vmatprep.subr.bf16.mxu1 %v1179_v31 }
  0x94   : > { %1040 = vmatpush3.bf16.msra.mxu0 %v1039_v32  ;;  %1049 = vmatpush3.bf16.msra.mxu1 %v1039_v32 }
  0x95   : > { %1041 = vmatprep.subr.bf16.mxu0 %v1179_v31  ;;  %1050 = vmatprep.subr.bf16.mxu1 %v1179_v31 }
 0x165   : > { %v1310_v36 = vpop.f32.mrb[0].mxu1 }
 0x166   : > { %v548_v37 = vmul.f32 %v1310_v36, %v1310_v36  ;;  %v1314_v38 = vpop.f32.mrb[0].mxu0  ;;  %v1316_v39 = vpop.f32.mrb[1].mxu1  ;;  %v541_v40 = vsel %vm539_vm5, %v1310_v36, 0.0 }
 0x167   : > { %v546_v41 = vmul.f32 %v1314_v38, %v1314_v38  ;;  %v547_v42 = vmul.f32 %v1316_v39, %v1316_v39  ;;  %v1324_v43 = vpop.f32.mrb[1].mxu0  ;;  %v540_v44 = vsel %vm539_vm5, %v1314_v38, 0.0  ;;  %v535_v45 = vsel %vm344_vm3, %v1316_v39, 0.0 }
 0x168   : > { %v545_v46 = vmul.f32 %v1324_v43, %v1324_v43  ;;  %v542_v47 = vadd.f32 %v541_v40, %v540_v44  ;;  %v534_v48 = vsel %vm344_vm3, %v1324_v43, 0.0  ;;  %v555_v49 = vsel %vm539_vm5, %v548_v37, 0.0  ;;  %v653_v44 = vld [vmem:[%s1446_s4 + $0x18] sm:$0xff] }
 0x169   : > { %v536_v50 = vadd.f32 %v535_v45, %v534_v48  ;;  %v550_v51 = vsel %vm344_vm3, %v547_v42, 0.0  ;;  %v554_v52 = vsel %vm539_vm5, %v546_v41, 0.0  ;;  %v652_v42 = vld [vmem:[%s1446_s4 + $0x10] sm:$0xff] }
 0x16a   : > { %543 = vadd.xlane.f32.xlu1 %v542_v47  ;;  %v549_v53 = vsel %vm344_vm3, %v545_v46, 0.0  ;;  %v556_v54 = vadd.f32 %v555_v49, %v554_v52  ;;  %v1042_v45 = vpack.c.bf16 %v653_v44, %v652_v42  ;;  %v655_v52 = vld [vmem:[%s1446_s4 + $0x28] sm:$0xff] }
 0x16b   : > { %537 = vadd.xlane.f32.xlu0 %v536_v50  ;;  %v551_v55 = vadd.f32 %v550_v51, %v549_v53  ;;  %v654_v51 = vld [vmem:[%s1446_s4 + $0x20] sm:$0xff] }
 0x16c   : > { %1043 = vmatpush3.bf16.msra.mxu0 %v1042_v45  ;;  %1052 = vmatpush3.bf16.msra.mxu1 %v1042_v45  ;;  %v1045_v53 = vpack.c.bf16 %v655_v52, %v654_v51 }
 0x16d   : > { %1044 = vmatprep.subr.bf16.mxu0 %v1179_v31  ;;  %1053 = vmatprep.subr.bf16.mxu1 %v1179_v31 }
 0x16f   : > { %552 = vadd.xlane.f32.xlu0 %v551_v55 }
 0x170   : > { %1046 = vmatpush3.bf16.msra.mxu0 %v1045_v53  ;;  %1055 = vmatpush3.bf16.msra.mxu1 %v1045_v53 }
 0x173   : > { %557 = vadd.xlane.f32.xlu0 %v556_v54 }
 0x1f7   : > { %v544_v59 = vpop.xlane.xlu1 %543 }
 0x1f8   : > { %v538_v57 = vpop.xlane.xlu0 %537  ;;  %v560_v61 = vmul.f32 0.03125, %v544_v59 }
 0x1f9   : > { %v559_v58 = vmul.f32 0.03125, %v538_v57 }
 0x1fa   : > { %v564_v3 = vmul.f32 %v560_v61, %v560_v61 }
 0x1fb   : > { %v563_v62 = vmul.f32 %v559_v58, %v559_v58 }
 0x1fc   : > { %v553_v60 = vpop.xlane.xlu0 %552 }
 0x1fd   : > { %v561_v63 = vmul.f32 0.03125, %v553_v60 }
 0x1ff   : > { %v565_v1 = vsub.f32 %v561_v63, %v563_v62 }
 0x200   : > { %v558_v2 = vpop.xlane.xlu0 %557 }
 0x201   : > { %v567_v4 = vadd.f32 1e-05, %v565_v1  ;;  %v562_v5 = vmul.f32 0.03125, %v558_v2 }
 0x203   : > { %1106 = vrsqrt.f32 %v567_v4  ;;  %v566_v7 = vsub.f32 %v562_v5, %v564_v3 }
 0x205   : > { %v568_v9 = vadd.f32 1e-05, %v566_v7 }
 0x207   : > { %1108 = vrsqrt.f32 %v568_v9 }
 0x20d   : > { %v1107_v14 = vpop.eup %1106 }
 0x20e   : > { %v571_v15 = vmul.f32 %v1107_v14, %v529_v13 }
 0x210   : > { %v577_v18 = vsel %vm526_vm8, %v571_v15, 0.0  ;;  %v573_v19 = vmul.f32 %v571_v15, %v559_v58  ;;  %v1181_v58 = vmov 0.0  }
 0x211   : > { %v1109_v20 = vpop.eup %1108  ;;  %583 = vperm.xlu1 %1105, %v577_v18   ;;  %1012 = vmatprep.mubr.msk.f32.mxu0 %vm1180_vm12, %v1181_v58 }
 0x212   : > { %v575_v21 = vsub.f32 %v532_v16, %v573_v19  ;;  %v572_v22 = vmul.f32 %v1109_v20, %v530_v17  ;;  %1027 = vmatprep.mubr.msk.f32.mxu1 %vm1180_vm12, %v1181_v58 }
 0x214   : > { %v579_v24 = vsel %vm526_vm8, %v575_v21, 0.0  ;;  %v578_v25 = vsel %vm527_vm11, %v572_v22, 0.0  ;;  %v574_v26 = vmul.f32 %v572_v22, %v560_v61 }
 0x215   : > { %597 = vperm.xlu1 %1105, %v579_v24   ;;  %588 = vperm.xlu0 %1104, %v578_v25  }
 0x216   : > { %v576_v27 = vsub.f32 %v533_v23, %v574_v26 }
 0x218   : > { %v580_v28 = vsel %vm527_vm11, %v576_v27, 0.0 }
 0x219   : > { %602 = vperm.xlu1 %1105, %v580_v28  }
 0x290   : > { %v584_v33 = vpop.permute.xlu1 %583 }
 0x291   : > { %v591_v34 = vmul.f32 %v584_v33, %v1324_v43  ;;  %v593_v40 = vmul.f32 %v584_v33, %v1316_v39 }
 0x294   : > { %v598_v35 = vpop.permute.xlu1 %597  ;;  %v589_v37 = vpop.permute.xlu0 %588 }
 0x295   : > { %v605_v41 = vadd.f32 %v598_v35, %v591_v34  ;;  %v607_v46 = vadd.f32 %v598_v35, %v593_v40  ;;  %v592_v48 = vmul.f32 %v1314_v38, %v589_v37  ;;  %v594_v43 = vmul.f32 %v1310_v36, %v589_v37 }
 0x297   : > { %v609_v47 = vmul.f32 0.2, %v605_v41  ;;  %v611_v54 = vmul.f32 0.2, %v607_v46 }
 0x298   : > { %v603_v49 = vpop.permute.xlu1 %602 }
 0x299   : > { %v606_v39 = vadd.f32 %v603_v49, %v592_v48  ;;  %v608_v50 = vadd.f32 %v603_v49, %v594_v43  ;;  %v613_v38 = vmax.f32 %v605_v41, %v609_v47  ;;  %v615_v59 = vmax.f32 %v607_v46, %v611_v54 }
 0x29b   : > { %v610_v55 = vmul.f32 0.2, %v606_v39  ;;  %v612_v36 = vmul.f32 0.2, %v608_v50  ;;  %v621_v61 = vrot.slane %v613_v38, 1  ;;  %v624_v0 = vrot.slane %v615_v59, 1 }
 0x29c   : > { %v633_v3 = vrot.slane %v613_v38, 2  ;;  %v636_v6 = vrot.slane %v615_v59, 2 }
 0x29d   : > { %v614_v56 = vmax.f32 %v606_v39, %v610_v55  ;;  %v616_v57 = vmax.f32 %v608_v50, %v612_v36 }
 0x29f   : > { %v622_v60 = vrot.slane %v614_v56, 1  ;;  %v625_v62 = vrot.slane %v616_v57, 1  ;;  %v634_v1 = vrot.slane %v614_v56, 2  ;;  %v637_v4 = vrot.slane %v616_v57, 2 }
 0x2a1   : > { %v623_v63 = vsel %vm301_vm0, %v621_v61, %v622_v60  ;;  %v626_v2 = vsel %vm301_vm0, %v624_v0, %v625_v62  ;;  %v635_v5 = vsel %vm320_vm1, %v633_v3, %v634_v1  ;;  %v638_v7 = vsel %vm320_vm1, %v636_v6, %v637_v4 }
 0x2a2   : > { %627 = vrot.lane.b32.xlu1 %v623_v63, %s1177_s29 }
 0x2a6   : > { %629 = vrot.lane.b32.xlu1 %v626_v2, %s1177_s29  ;;  %s284_s29 = scalar_select %p283_p10, %s1247_s28, 1 }
 0x2a8   : > { %s944_s19 = sshll.u32 %s284_s29, 3 }
 0x2a9   : > { %s286_s22 = scalar_lea.vmem %s1447_s5, %s944_s19  ;;  %s290_s14 = scalar_lea.vmem %s1448_s6, %s944_s19 }
 0x2aa   : > { %639 = vrot.lane.b32.xlu1 %v635_v5, %s1182_s13  ;;  %v803_v35 = vld [vmem:[%s286_s22] sm:$0xff]  ;;  %s1183_s22 = smov [#allocation2]  }
 0x2ab   : > { %v804_v41 = vld [vmem:[%s290_s14] sm:$0xff]  ;;  %s1116_s8 = sshll.u32 %s1183_s22, 4  ;;  %s1117_s8 = int_to_ptr.vmem [resolvable:$false] %s1116_s8 }
 0x2ac   : > { %s1118_s9 = scalar_lea.vmem %s1117_s8, 512  ;;  %p1119_p0 = scmp.lt.s32.totalorder %s1391_s18, %s1117_s8 }
 0x2ae   : > { %641 = vrot.lane.b32.xlu1 %v638_v7, %s1182_s13  ;;  %s955_s13 = sshll.u32 %s1247_s28, 7  ;;  %s1112_s28 = scalar_lea.vmem %s1391_s18, 256 }
 0x2af   : > { %s1396_s20 = scalar_lea.hbm %s1449_s7, %s955_s13  ;;  %p1113_p11 = scmp.ne.s32.totalorder %s1391_s18, %s1112_s28 }
 0x2b0   : > { %p1120_p1 = scmp.lt.s32.totalorder %s1118_s9, %s1112_s28 }
 0x2b1   : > { %p1114_p12 = pnand %p1113_p11, %p1264_p5 }
 0x2b2   : > { %p1121_p2 = por %p1120_p1, %p1119_p0 }
 0x2b3   : > { %p1115_p13 = pneg %p1114_p12 }
 0x2b5   : > { %p1122_p3 = pnand %p1121_p2, %p1115_p13 }
 0x314   : > { %v628_v8 = vpop.permute.xlu1 %627 }
 0x315   : > { %v645_v10 = vsel %vm344_vm3, %v613_v38, %v628_v8 }
 0x318   : > { %v630_v9 = vpop.permute.xlu1 %629 }
 0x319   : > { %v646_v13 = vsel %vm344_vm3, %v615_v59, %v630_v9 }
 0x31c   : > { %v640_v11 = vpop.permute.xlu1 %639 }
 0x31d   : > { %v648_v12 = vsel %vm647_vm13, %v645_v10, %v640_v11 }
 0x31e   : > { %1013 = vmatmul.mubr.msk.f32.vlgmr.msra.gmra.mrb[2].mxu0 %vm656_vm14, %v648_v12 }
 0x320   : > { %v642_v14 = vpop.permute.xlu1 %641 }
 0x321   : > { %v649_v15 = vsel %vm647_vm13, %v646_v13, %v642_v14 }
 0x322   : > { %1028 = vmatmul.mubr.msk.f32.vlgmr.msra.gmra.mrb[2].mxu1 %vm656_vm14, %v649_v15 }
 0x3f1   : > { %v726_v16 = vpop.f32.mrb[2].mxu0 }
 0x3f2   : > { %v1014_v17 = vpop.f32.mrb[3].mxu0  ;;  %v810_v18 = vmul.f32 %v726_v16, %v726_v16  ;;  %v805_v22 = vsel %vm344_vm3, %v726_v16, 0.0 }
 0x3f4   : > { %v812_v25 = vsel %vm344_vm3, %v810_v18, 0.0 }
 0x3f5   : > { %v799_v19 = vpop.f32.mrb[2].mxu1 }
 0x3f6   : > { %v811_v20 = vmul.f32 %v799_v19, %v799_v19  ;;  %v1029_v21 = vpop.f32.mrb[3].mxu1  ;;  %v806_v23 = vsel %vm344_vm3, %v799_v19, 0.0 }
 0x3f7   : > { %v807_v24 = vadd.f32 %v806_v23, %v805_v22 }
 0x3f8   : > { %v813_v26 = vsel %vm344_vm3, %v811_v20, 0.0 }
 0x3f9   : > { %808 = vadd.xlane.f32.xlu1 %v807_v24  ;;  %v814_v27 = vadd.f32 %v813_v26, %v812_v25 }
 0x3fb   : > { %815 = vadd.xlane.f32.xlu0 %v814_v27 }
 0x486   : > { %v809_v28 = vpop.xlane.xlu1 %808 }
 0x487   : > { %v817_v29 = vmul.f32 0.03125, %v809_v28 }
 0x488   : > { %v816_v30 = vpop.xlane.xlu0 %815 }
 0x489   : > { %v819_v31 = vmul.f32 %v817_v29, %v817_v29  ;;  %v818_v32 = vmul.f32 0.03125, %v816_v30 }
 0x48b   : > { %v820_v33 = vsub.f32 %v818_v32, %v819_v31 }
 0x48d   : > { %v821_v34 = vadd.f32 1e-05, %v820_v33 }
 0x48f   : > { %1110 = vrsqrt.f32 %v821_v34 }
 0x499   : > { %v1111_v37 = vpop.eup %1110 }
 0x49a   : > { %v823_v40 = vmul.f32 %v1111_v37, %v803_v35 }
 0x49c   : > { %828 = vperm.xlu1 %1105, %v823_v40   ;;  %v824_v42 = vmul.f32 %v823_v40, %v817_v29 }
 0x49e   : > { %v825_v44 = vsub.f32 %v804_v41, %v824_v42 }
 0x4a0   : > { %835 = vperm.xlu0 %1104, %v825_v44  }
 0x51b   : > { %v829_v45 = vpop.permute.xlu1 %828 }
 0x51c   : > { %v831_v46 = vmul.f32 %v829_v45, %v726_v16  ;;  %v832_v47 = vmul.f32 %v829_v45, %v799_v19 }
 0x51f   : > { %v836_v48 = vpop.permute.xlu0 %835 }
 0x520   : > { %v838_v43 = vadd.f32 %v836_v48, %v831_v46  ;;  %v839_v49 = vadd.f32 %v836_v48, %v832_v47 }
 0x522   : > { %v840_v39 = vmul.f32 0.2, %v838_v43  ;;  %v841_v50 = vmul.f32 0.2, %v839_v49 }
 0x524   : > { %v842_v51 = vmax.f32 %v838_v43, %v840_v39  ;;  %v843_v52 = vmax.f32 %v839_v49, %v841_v50 }
 0x526   : > { %844 = vst.msk [vmem:[%s282_s17] sm:$0xff] %vm344_vm3, %v842_v51  ;;  %845 = vst.msk [vmem:[%s282_s17 + $0x8] sm:$0xff] %vm344_vm3, %v843_v52 }
 0x527   : > { %1125 = shalt.err (!%p1122_p3)
}
 0x528   : > { %s1126_s14 = scalar_lea.hbm %s1396_s20, 256  ;;  %s1130_s17 = scalar_lea.hbm %s1449_s7, 512 }
 0x529   : > { %p1127_p4 = scmp.ne.s32.totalorder %s1396_s20, %s1126_s14  ;;  %p1131_p9 = scmp.lt.u32.totalorder %s1396_s20, %s1449_s7 }
 0x52a   : > { %p1132_p10 = scmp.lt.u32.totalorder %s1130_s17, %s1126_s14  ;;  %p1134_p12 = scmp.lt.u32.totalorder %s1126_s14, %s1396_s20 }
 0x52b   : > { %p1128_p7 = pnand %p1127_p4, %p1264_p5 }
 0x52c   : > { %p1133_p11 = por %p1132_p10, %p1131_p9 }
 0x52d   : > { %p1129_p8 = pneg %p1128_p7 }
 0x52e   : > { %p1135_p13 = por %p1134_p12, %p1133_p11 }
 0x530   : > { %p1136_p0 = pnand %p1135_p13, %p1129_p8 }
 0x532   : > { %1139 = shalt.err (!%p1136_p0)
}
 0x533   : > { %s1184_s19 = smov 128   ;;  %s1185_s28 = smov 256  }
 0x534   : > { %1056 = dma.vmem_to_hbm [thread:$0]  (%p1264_p5), %s1391_s18, 256, %s1396_s20, %s1400_s21, %s1184_s19, %s1185_s28, %s1176_s23  }
 0x535 PF: > { %p1062_p1 = scmp.ge.s32.totalorder %s1174_s27, 2  ;;  %s874_s22 = sand.u32 1, %s1162_s24  }
 0x536   : > { %s875_s8 = scalar_lea.sflag [#allocation3], %s874_s22 }
 0x537   : > { %p1059_p2 = pnand %p1062_p1, %p1268_p6 }
 0x539   : > { %1157 = dma.done.wait (!%p1059_p2), %s875_s8, 256  }
 0x53a   : > { %1159 = vsyncadd (!%p1059_p2), %s875_s8, 4294967040  ;;  %p17_p3 = scmp.ge.s32.totalorder %s1251_s30, 4   ;;  %s1452_s24 = smov %s1166_s25 }
 0x53b   : > { %s1453_s25 = smov %s1170_s26  ;;  %s1454_s26 = smov %s1262_s10 }
 0x53c   : > { %s1455_s27 = smov %s1251_s30  ;;  %19 = sbr.rel (!%p17_p3) target bundleno = 3 (0x3), region = 89 }
 0x543   :  { %880 = vsyncpa [#allocation3], 1 }
 0x544   :  { %882 = vsyncpa [#allocation3 + $0x1], 1 }

</bundles_post_ra>
